<compile_context>
chip_gen: v5e
topology: v5e:2x2
jax: 0.10.0
libtpu: 0.0.40
codegen_flags: <defaults>
</compile_context>

<pallas_src>
import functools
import math

import jax
import jax.numpy as jnp
from jax.experimental import pallas as pl
from jax.experimental.pallas import tpu as pltpu

_LANE_CHOICES = (1024, 512, 256, 128)   # lane-dense widths (multiples of 128)
_MAX_ROWS = 512                         # 512*1024*4B = 2 MiB f32 per operand per buffer


# ---------------------------------------------------------------------------
# Slab layout helpers (wrapper-side plumbing only)
# ---------------------------------------------------------------------------
def _slab_layout(total):
    """Return (lanes, padded_rows, row_tile) for the flat (rows, lanes) slab."""
    lanes = 128
    for c in _LANE_CHOICES:
        if total % c == 0:
            lanes = c
            break
    rows = pl.cdiv(total, lanes)
    if rows <= _MAX_ROWS:
        # single block == full array dims -> (8,128) divisibility waived, no padding
        return lanes, rows, rows
    # largest multiple-of-8 divisor of rows (<= _MAX_ROWS): no row padding needed
    for t in range(_MAX_ROWS, 7, -8):
        if rows % t == 0:
            return lanes, rows, t
    # fallback: pad rows to a multiple of _MAX_ROWS (rare for NN shapes)
    padded_rows = pl.cdiv(rows, _MAX_ROWS) * _MAX_ROWS
    return lanes, padded_rows, _MAX_ROWS


def _to_slab(a, lanes, padded_rows):
    flat = a.reshape(-1)
    pad = padded_rows * lanes - flat.shape[0]
    if pad:
        flat = jnp.pad(flat, (0, pad))
    return flat.reshape(padded_rows, lanes)


def _from_slab(slab, shape):
    total = math.prod(shape)
    flat = slab.reshape(-1)
    if flat.shape[0] != total:
        flat = flat[:total]
    return flat.reshape(shape)


# ---------------------------------------------------------------------------
# Kernel 1: mask generation (= set_weights).  int8 keep-mask from uniform
# uint32 bits via integer-threshold compare.  Tiled 1-D parallel grid.
# ---------------------------------------------------------------------------
def _gal_mask_kernel(bits_ref, mask_ref, *, thresh):
    # drop with probability p:  P(bits < thresh) = thresh / 2^32 = p
    keep = bits_ref[...] >= jnp.uint32(thresh)
    mask_ref[...] = keep.astype(jnp.int8)


def make_gal_mask_slab(shape, p, seed):
    """Fixed dropout keep-mask as an int8 {0,1} slab (lane-dense)."""
    total = math.prod(shape)
    lanes, padded_rows, row_tile = _slab_layout(total)
    bits = jax.random.bits(jax.random.PRNGKey(seed),
                           (padded_rows, lanes), dtype=jnp.uint32)
    thresh = min(int(round(float(p) * (1 << 32))), (1 << 32) - 1)
    n_elems = padded_rows * lanes
    return pl.pallas_call(
        functools.partial(_gal_mask_kernel, thresh=thresh),
        out_shape=jax.ShapeDtypeStruct((padded_rows, lanes), jnp.int8),
        grid=(padded_rows // row_tile,),
        in_specs=[pl.BlockSpec((row_tile, lanes), lambda i: (i, 0))],
        out_specs=pl.BlockSpec((row_tile, lanes), lambda i: (i, 0)),
        compiler_params=pltpu.CompilerParams(dimension_semantics=("parallel",)),
        cost_estimate=pl.CostEstimate(flops=n_elems, transcendentals=0,
                                      bytes_accessed=n_elems * 5),
    )(bits)


# ---------------------------------------------------------------------------
# Kernel 2: forward hot path  out = X * (mask_i8 * 1/(1-p))   (VPU, mem-bound)
# ---------------------------------------------------------------------------
def _gal_apply_kernel(x_ref, m_ref, o_ref, *, scale):
    m = m_ref[...].astype(jnp.float32) * jnp.float32(scale)
    o_ref[...] = (x_ref[...].astype(jnp.float32) * m).astype(o_ref.dtype)


def apply_gal_dropout(x, mask_slab, scale):
    shape = x.shape
    total = math.prod(shape)
    lanes, padded_rows, row_tile = _slab_layout(total)
    assert mask_slab.shape == (padded_rows, lanes)
    x_slab = _to_slab(x, lanes, padded_rows)
    n_elems = padded_rows * lanes
    out_slab = pl.pallas_call(
        functools.partial(_gal_apply_kernel, scale=float(scale)),
        out_shape=jax.ShapeDtypeStruct((padded_rows, lanes), x.dtype),
        grid=(padded_rows // row_tile,),
        in_specs=[pl.BlockSpec((row_tile, lanes), lambda i: (i, 0)),
                  pl.BlockSpec((row_tile, lanes), lambda i: (i, 0))],
        out_specs=pl.BlockSpec((row_tile, lanes), lambda i: (i, 0)),
        compiler_params=pltpu.CompilerParams(dimension_semantics=("parallel",)),
        cost_estimate=pl.CostEstimate(
            flops=2 * n_elems, transcendentals=0,
            bytes_accessed=n_elems * (2 * x.dtype.itemsize + 1)),
    )(x_slab, mask_slab)
    return _from_slab(out_slab, shape)


# ---------------------------------------------------------------------------
# Module wrapper mirroring the PyTorch GalDropout API
# ---------------------------------------------------------------------------
class GalDropout:
    """Applies GAL dropout to input samples with a fixed mask (Pallas TPU)."""

    def __init__(self, dropout=0.0):
        assert 0 <= dropout < 1
        self._dropout = float(dropout)
        self._mask_slab = None
        self._mask_shape = None
        self.training = True

    @property
    def _scale(self):
        return 1.0 / (1.0 - self._dropout)

    def set_weights(self, X, seed=0):
        """Calculates a new (fixed) dropout mask."""
        if self.training and self._dropout:
            self._mask_slab = make_gal_mask_slab(X.shape, self._dropout, seed)
            self._mask_shape = X.shape
        else:
            # eval / p==0: forward is a passthrough, no need to materialize ones
            self._mask_slab = None
            self._mask_shape = X.shape

    def mask(self, dtype=jnp.float32):
        """Dense mask with values in {0, 1/(1-p)} (for inspection / reference)."""
        if self._mask_slab is None:
            return jnp.ones(self._mask_shape, dtype)
        dense = _from_slab(self._mask_slab, self._mask_shape)
        return dense.astype(dtype) * jnp.asarray(self._scale, dtype)

    def __call__(self, X):
        """Applies the fixed dropout mask to X."""
        if not self.training or not self._dropout:
            return X
        assert self._mask_slab is not None and X.shape == self._mask_shape
        return apply_gal_dropout(X, self._mask_slab, self._scale)


if __name__ == "__main__":
    key = jax.random.PRNGKey(0)
    x = jax.random.normal(key, (2, 4, 16, 16), dtype=jnp.float32)  # NCHW

    drop = GalDropout(dropout=0.5)
    drop.training = True
    drop.set_weights(x, seed=0)          # fixed int8 mask, thresholded in-kernel
    y = drop(x)                          # X * mask in-kernel
    y = jax.block_until_ready(y)

    # sanity checks against a plain-JAX reference using the same fixed mask
    mask_f = drop.mask(jnp.float32)
    ref = x * mask_f
    assert y.shape == x.shape and y.dtype == x.dtype
    assert jnp.allclose(y, ref, rtol=1e-6, atol=1e-6)
    # mask values must be exactly {0, 1/(1-p)} (= {0, 2} for p=0.5)
    assert bool(jnp.all((mask_f == 0.0) | (jnp.abs(mask_f - 2.0) < 1e-6)))
    # some elements kept and some dropped at p=0.5 on 2048 elements
    assert 0 < int(jnp.sum(mask_f == 0.0)) < mask_f.size

    # exercise the multi-block (tiled) path: 1M elems -> rows=1024, row_tile=512
    x_big = jax.random.normal(jax.random.PRNGKey(1), (2, 8, 256, 256),
                              dtype=jnp.float32)
    drop_big = GalDropout(dropout=0.3)
    drop_big.training = True
    drop_big.set_weights(x_big, seed=7)
    y_big = jax.block_until_ready(drop_big(x_big))
    assert jnp.allclose(y_big, x_big * drop_big.mask(jnp.float32),
                        rtol=1e-6, atol=1e-6)

    # eval mode passthrough
    drop.training = False
    assert jnp.array_equal(drop(x), x)

    # p=0 passthrough
    drop0 = GalDropout(dropout=0.0)
    drop0.training = True
    drop0.set_weights(x)
    assert jnp.array_equal(drop0(x), x)

    print("KERNEL_OK")
</pallas_src>

<mosaic_0001>
module attributes {stable_mosaic.version = 11 : i64} {
  func.func @_gal_mask_kernel(%arg0: i32, %arg1: memref<2x1024xi32, #tpu.memory_space<vmem>>, %arg2: memref<2x1024xi8, #tpu.memory_space<vmem>>) attributes {dimension_semantics = [#tpu.dimension_semantics<parallel>], iteration_bounds = array<i64: 1>, scalar_prefetch = 0 : i64, scratch_operands = 0 : i64, tpu.core_type = #tpu.core_type<tc>, window_params = [{transform_indices = @transform_0, window_bounds = array<i64: 2, 1024>}, {transform_indices = @transform_1, window_bounds = array<i64: 2, 1024>}]} {
    %c0 = arith.constant 0 : index
    %c0_0 = arith.constant 0 : index
    %0 = vector.load %arg1[%c0, %c0_0] : memref<2x1024xi32, #tpu.memory_space<vmem>>, vector<2x1024xi32>
    %c-2147483648_i32 = arith.constant -2147483648 : i32
    %1 = vector.broadcast %c-2147483648_i32 : i32 to vector<2x1024xi32>
    %2 = arith.cmpi uge, %0, %1 : vector<2x1024xi32>
    %3 = arith.extui %2 : vector<2x1024xi1> to vector<2x1024xi8>
    %c0_1 = arith.constant 0 : index
    %c0_2 = arith.constant 0 : index
    %4 = vector.load %arg2[%c0_1, %c0_2] : memref<2x1024xi8, #tpu.memory_space<vmem>>, vector<2x1024xi8>
    tpu.vector_store %arg2[%c0_1, %c0_2], %3 {strides = array<i32>} : memref<2x1024xi8, #tpu.memory_space<vmem>>, vector<2x1024xi8>,
    return
  }
  func.func @transform_0(%arg0: i32) -> (i32, i32) {
    %c0_i32 = arith.constant 0 : i32
    %c0_i32_0 = arith.constant 0 : i32
    return %arg0, %c0_i32 : i32, i32
  }
  func.func @transform_1(%arg0: i32) -> (i32, i32) {
    %c0_i32 = arith.constant 0 : i32
    %c0_i32_0 = arith.constant 0 : i32
    return %arg0, %c0_i32 : i32, i32
  }
}

</mosaic_0001>

<bundles_post_ra>
// kernel: tpu_custom_call.1
= control target key start
LH: loop header
LB: loop body
LE: loop exit
PB: predicated region body
PF: predicated region fallthrough
CT: control target
= control target key end

     0   :  { %6 = vsyncpa [#allocation3], 0  ;;  %s316_s0 = inlined_call_operand.hbm [shape: u32[2,1024], index: 0, kind: input, shape index: {}]   ;;  %s317_s1 = inlined_call_operand.hbm [shape: s8[2,1024], index: 1, kind: output, shape index: {}]  }
   0x1   :  { %7 = vsyncpa [#allocation4], 0  ;;  %s13_s8 = sshll.u32 %s316_s0, 4  ;;  %s227_s9 = smov [#allocation2]   ;;  %s14_s8 = int_to_ptr.hbm [resolvable:$true] %s13_s8 }
   0x2   :  { %s15_s10 = sshll.u32 %s227_s9, 4  ;;  %s16_s10 = int_to_ptr.vmem [resolvable:$true] %s15_s10 }
   0x3   :  { %18 = dma.hbm_to_vmem [thread:$0]  %s14_s8, 256, %s16_s10, [#allocation3]  }
   0x4   :  { %223 = dma.done.wait [#allocation3], 256  }
   0x5   :  { %224 = vsyncadd [#allocation3], 4294967040  ;;  %v25_v0 = vld [vmem:[#allocation2] sm:$0xff]  ;;  %v26_v1 = vld [vmem:[#allocation2 + $0x8] sm:$0xff]  ;;  %v228_v4 = vmov 0   ;;  %vm320_vm2 = vcmask 1040384  }
   0x6   :  { %v170_v2 = vxor.u32 2147483648, %v25_v0  ;;  %v171_v3 = vxor.u32 2147483648, %v26_v1  ;;  %vm120_vm3 = vsmask.f32 256  ;;  %vm122_vm4 = vcmask 1041409   ;;  %s229_s0 = smov [#allocation5]  }
   0x7   :  { %vm123_vm5 = vsmask.f32 1280  ;;  %vm246_vm6 = vmand %vm320_vm2, %vm120_vm3  ;;  %vm318_vm8 = vcmask 1042434   ;;  %vm127_vm9 = vsmask.f32 2304  ;;  %vm130_vm10 = vcmask 1043459  }
   0x8   :  { %vm29_vm0 = vcmp.ge.s32.totalorder %v170_v2, 0  ;;  %vm32_vm1 = vcmp.ge.s32.totalorder %v171_v3, 0  ;;  %vm250_vm7 = vmand %vm122_vm4, %vm123_vm5  ;;  %vm131_vm11 = vsmask.f32 3328  ;;  %vm319_vm5 = vcmask 1044484   ;;  %s158_s11 = sshll.u32 %s229_s0, 4  ;;  %s159_s11 = int_to_ptr.vmem [resolvable:$true] %s158_s11 }
   0x9   :  { %v33_v5 = vsel %vm29_vm0, 1, %v228_v4  ;;  %v34_v6 = vsel %vm32_vm1, 1, %v228_v4  ;;  %vm125_vm12 = vmor %vm250_vm7, %vm246_vm6  ;;  %vm135_vm6 = vsmask.f32 4352  ;;  %s160_s14 = sshll.u32 %s317_s1, 4  ;;  %v150_v53 = vld [vmem:[#allocation5] sm:$0xff]  ;;  %s161_s14 = int_to_ptr.hbm [resolvable:$true] %s160_s14 }
   0xa   :  { %35 = vst [vmem:[#allocation1] ss:$2 sm:$0xff] %v33_v5  ;;  %vm128_vm13 = vmand %vm318_vm8, %vm127_vm9 }
   0xb   :  { %37 = vst [vmem:[#allocation1 + $0x10] ss:$2 sm:$0xff] %v34_v6  ;;  %vm129_vm3 = vmor %vm128_vm13, %vm125_vm12  ;;  %vm143_vm13 = vsmask.f32 6400 }
   0xc   :  { %vm132_vm4 = vmand %vm130_vm10, %vm131_vm11  ;;  %vm110_vm10 = vcmask 1046534  }
   0xd   :  { %vm133_vm9 = vmor %vm132_vm4, %vm129_vm3  ;;  %vm146_vm3 = vcmask 1047559  }
  0x11   :  { %v38_v9 = vld.sshfl [vmem:[#allocation1] sm:$0xff pattern:$0x75643120]  ;;  %v39_v10 = vld.sshfl [vmem:[#allocation1 + $0x8] sm:$0xff pattern:$0x75643120] }
  0x12   :  { %v40_v11 = vld.sshfl [vmem:[#allocation1 + $0x10] sm:$0xff pattern:$0x75643120]  ;;  %v41_v12 = vld.sshfl [vmem:[#allocation1 + $0x18] sm:$0xff pattern:$0x75643120] }
  0x13   :  { %vm42_vm14 = vcmp.ne.s32.totalorder %v38_v9, 0  ;;  %vm43_vm15 = vcmp.ne.s32.totalorder %v39_v10, 0  ;;  %vm44_vm0 = vcmp.ne.s32.totalorder %v40_v11, 0  ;;  %vm45_vm1 = vcmp.ne.s32.totalorder %v41_v12, 0 }
  0x14   :  { %v46_v13 = vsel %vm42_vm14, 1, %v228_v4  ;;  %v47_v14 = vsel %vm43_vm15, 1, %v228_v4  ;;  %v48_v15 = vsel %vm44_vm0, 1, %v228_v4  ;;  %v49_v16 = vsel %vm45_vm1, 1, %v228_v4  ;;  %vm136_vm14 = vmand %vm319_vm5, %vm135_vm6 }
  0x15   :  { %v50_v17 = vpack.c.b16 %v47_v14, %v46_v13  ;;  %v51_v18 = vpack.c.b16 %v49_v16, %v48_v15  ;;  %vm138_vm15 = vcmask 1045509   ;;  %vm139_vm0 = vsmask.f32 5376  ;;  %vm267_vm8 = vmor %vm136_vm14, %vm133_vm9 }
  0x16   :  { %vm271_vm12 = vmand %vm138_vm15, %vm139_vm0  ;;  %vm147_vm9 = vsmask.f32 7424 }
  0x17   :  { %v52_v19 = vpack.c.b8 %v51_v18, %v50_v17  ;;  %vm141_vm11 = vmor %vm271_vm12, %vm267_vm8  ;;  %vm335_vm8 = vcmask 1044484   ;;  %vm336_vm12 = vcmask 1041408  }
  0x18   :  { %vm144_vm5 = vmand %vm110_vm10, %vm143_vm13 }
  0x19   :  { %vm53_vm7 = vnez %v52_v19  ;;  %vm294_vm13 = vmor %vm144_vm5, %vm141_vm11  ;;  %vm116_vm5 = vcmask 1043456  }
  0x1a   :  { %v54_v20 = vsel %vm53_vm7, 16843009, %v228_v4 }
  0x1b   :  { %56 = vst [vmem:[#allocation1] ss:$9 sm:$0xff] %v54_v20 }
  0x22   :  { %v57_v23 = vld [vmem:[#allocation1] sm:$0xff]  ;;  %v59_v24 = vld [vmem:[#allocation1 + $0x9] sm:$0xff]  ;;  %v61_v25 = vld [vmem:[#allocation1 + $0x12] sm:$0xff] }
  0x23   :  { %v63_v26 = vld [vmem:[#allocation1 + $0x1b] sm:$0xff]  ;;  %v65_v27 = vld [vmem:[#allocation1 + $0x24] sm:$0xff]  ;;  %v67_v28 = vld [vmem:[#allocation1 + $0x2d] sm:$0xff]  ;;  %vm73_vm4 = vnez %v57_v23  ;;  %vm74_vm6 = vnez %v59_v24  ;;  %vm75_vm7 = vnez %v61_v25 }
  0x24   :  { %v69_v29 = vld [vmem:[#allocation1 + $0x36] sm:$0xff]  ;;  %v71_v30 = vld [vmem:[#allocation1 + $0x3f] sm:$0xff]  ;;  %vm76_vm14 = vnez %v63_v26  ;;  %vm77_vm15 = vnez %v65_v27  ;;  %vm78_vm0 = vnez %v67_v28  ;;  %v81_v31 = vsel %vm73_vm4, 16843009, %v228_v4 }
  0x25   :  { %vm79_vm2 = vnez %v69_v29  ;;  %vm80_vm1 = vnez %v71_v30  ;;  %v82_v32 = vsel %vm74_vm6, 16843009, %v228_v4  ;;  %v83_v33 = vsel %vm75_vm7, 16843009, %v228_v4 }
  0x26   :  { %v84_v34 = vsel %vm76_vm14, 16843009, %v228_v4  ;;  %v85_v35 = vsel %vm77_vm15, 16843009, %v228_v4  ;;  %v86_v36 = vsel %vm78_vm0, 16843009, %v228_v4 }
  0x27   :  { %v87_v37 = vsel %vm79_vm2, 16843009, %v228_v4  ;;  %v88_v38 = vsel %vm80_vm1, 16843009, %v228_v4  ;;  %v89_v39 = vrot.slane %v82_v32, 7  ;;  %v90_v40 = vrot.slane %v83_v33, 6  ;;  %vm300_vm2 = vmand %vm146_vm3, %vm147_vm9 }
  0x28   :  { %v91_v42 = vrot.slane %v84_v34, 5  ;;  %v92_v43 = vrot.slane %v85_v35, 4  ;;  %v93_v44 = vrot.slane %v86_v36, 3  ;;  %v94_v45 = vrot.slane %v87_v37, 2  ;;  %vm149_vm11 = vmor %vm300_vm2, %vm294_vm13 }
  0x29   :  { %v95_v47 = vrot.slane %v88_v38, 1  ;;  %vm333_vm1 = vcmask 1040384   ;;  %vm114_vm4 = vcmask 1045508   ;;  %vm334_vm6 = vcmask 1042434  }
  0x2a   :  { %v99_v48 = vsel %vm333_vm1, %v81_v31, %v89_v39  ;;  %v103_v49 = vsel %vm334_vm6, %v90_v40, %v91_v42  ;;  %v109_v50 = vsel %vm335_vm8, %v92_v43, %v93_v44 }
  0x2b   :  { %v105_v51 = vsel %vm336_vm12, %v99_v48, %v103_v49  ;;  %v113_v52 = vsel %vm110_vm10, %v94_v45, %v95_v47 }
  0x2c   :  { %v115_v54 = vsel %vm114_vm4, %v109_v50, %v113_v52 }
  0x2d   :  { %v117_v55 = vsel %vm116_vm5, %v105_v51, %v115_v54 }
  0x2e   :  { %v151_v56 = vsel %vm149_vm11, %v117_v55, %v150_v53 }
  0x2f   :  { %152 = vst [vmem:[#allocation5] sm:$0xff] %v151_v56 }
  0x30   :  { %163 = dma.vmem_to_hbm [thread:$0]  %s159_s11, 128, %s161_s14, [#allocation4]  }
  0x31   :  { %225 = dma.done.wait [#allocation4], 128  }
  0x32   :  { %226 = vsyncadd [#allocation4], 4294967168 }
  0x33   :  { %168 = vsyncpa [#allocation3], 1 }
  0x34   :  { %169 = vsyncpa [#allocation4], 1 }

</bundles_post_ra>
